<compile_context>
chip_gen: v5e
topology: v5e:2x2
jax: 0.10.0
libtpu: 0.0.40
codegen_flags: <defaults>
</compile_context>

<pallas_src>
import functools

import jax
import jax.numpy as jnp
from jax import lax
from jax.experimental import pallas as pl
from jax.experimental.pallas import tpu as pltpu


def _round_up(x, m):
    return ((x + m - 1) // m) * m


def _conv3x3s2_kernel(e0_ref, e1_ref, e2_ref, o0_ref, o1_ref, o2_ref,
                      w_ref, b_ref, out_ref, *, wo):
    """Fused 3x3 / stride-2 conv + bias + ReLU for one batch element.

    e*_ref : (1, (Ho+1)*Wo, Cin) bf16  even-row tap slabs, column offset 0/1/2
    o*_ref : (1,  Ho   *Wo, Cin) bf16  odd-row  tap slabs, column offset 0/1/2
    w_ref  : (9, Cin, Cout_p)    bf16  tap-major weight panels (t = dh*3+dw)
    b_ref  : (1, Cout_p)         f32
    out_ref: (1, Ho*Wo, Cout_p)  bf16  lane-dense output
    """
    m = out_ref.shape[1]                     # Ho*Wo output pixels
    even = (e0_ref, e1_ref, e2_ref)
    odd = (o0_ref, o1_ref, o2_ref)
    acc = jnp.zeros((m, out_ref.shape[2]), jnp.float32)
    for dh in range(3):
        for dw in range(3):
            if dh % 2 == 0:
                start = (dh // 2) * wo       # row shift inside the even slab
                tap = even[dw][0, start:start + m, :]
            else:
                tap = odd[dw][0, 0:m, :]
            acc = acc + jnp.dot(tap, w_ref[dh * 3 + dw],
                                preferred_element_type=jnp.float32)
    # Bias + ReLU in f32, bf16 store (halves HBM writeback vs f32 outputs).
    out_ref[0] = jnp.maximum(acc + b_ref[...], 0.0).astype(out_ref.dtype)


def conv3x3_s2_relu_nhwc(x, w_mat, b_vec):
    """3x3 conv, stride 2, pad 1, + bias + ReLU, channels-last, fused im2col.

    x: (B, H, W, Cin) bf16, w_mat: (9, Cin, Cout_p) bf16, b_vec: (1, Cout_p) f32
    -> (B, Ho, Wo, Cout_p) bf16  with Ho = H//2, Wo = W//2.
    """
    B, H, W_, Cin = x.shape
    assert H % 2 == 0 and W_ % 2 == 0
    Ho, Wo = H // 2, W_ // 2
    Cout_p = w_mat.shape[2]

    xp = jnp.pad(x, ((0, 0), (1, 1), (1, 1), (0, 0)))   # (B, H+2, W+2, Cin)
    ev = xp[:, 0::2]                                    # (B, Ho+1, W+2, Cin)
    od = xp[:, 1:H:2]                                   # (B, Ho,   W+2, Cin)

    # Column-offset variants (dw = 0, 1, 2): exactly Wo columns each, then the
    # (rows, Wo) spatial dims are flattened so every conv tap is a contiguous
    # 2-D slab in the kernel (no in-kernel relayout / strided gather).
    def _slab(t, s, rows):
        return t[:, :, s:s + 2 * (Wo - 1) + 1:2, :].reshape(B, rows * Wo, Cin)

    e_slabs = [_slab(ev, s, Ho + 1) for s in range(3)]
    o_slabs = [_slab(od, s, Ho) for s in range(3)]

    kernel = functools.partial(_conv3x3s2_kernel, wo=Wo)
    out = pl.pallas_call(
        kernel,
        out_shape=jax.ShapeDtypeStruct((B, Ho * Wo, Cout_p), jnp.bfloat16),
        grid=(B,),
        in_specs=(
            [pl.BlockSpec((1, (Ho + 1) * Wo, Cin), lambda i: (i, 0, 0))] * 3
            + [pl.BlockSpec((1, Ho * Wo, Cin), lambda i: (i, 0, 0))] * 3
            + [pl.BlockSpec((9, Cin, Cout_p), lambda i: (0, 0, 0)),
               pl.BlockSpec((1, Cout_p), lambda i: (0, 0))]),
        out_specs=pl.BlockSpec((1, Ho * Wo, Cout_p), lambda i: (i, 0, 0)),
        compiler_params=pltpu.CompilerParams(
            # B independent steps -> both TensorCores busy on v7x megacore.
            dimension_semantics=("parallel",)),
    )(*e_slabs, *o_slabs, w_mat, b_vec)

    return out.reshape(B, Ho, Wo, Cout_p)


def interpolate_mask_nearest(mask, size):
    """F.interpolate(m[None].float(), size=size).to(bool)[0] semantics."""
    B, H, W = mask.shape
    h, w = size
    ih = jnp.floor(jnp.arange(h) * (H / h)).astype(jnp.int32)
    iw = jnp.floor(jnp.arange(w) * (W / w)).astype(jnp.int32)
    m = mask.astype(jnp.float32)
    m = m[:, ih, :][:, :, iw]
    return m.astype(jnp.bool_)
# TODO(synk): mask nearest-neighbor resize is a pure gather; kept as plain JAX.


class NestedTensor:
    def __init__(self, tensors, mask):
        self.tensors = tensors
        self.mask = mask

    def decompose(self):
        return self.tensors, self.mask


class BackboneBase:
    """Synthetic 4-stage backbone (each stage: 3x3 stride-2 conv + ReLU),
    mirroring IntermediateLayerGetter over layer1..layer4.  Parameter
    freezing in the torch module does not affect forward()."""

    LAYER_ORDER = ("layer1", "layer2", "layer3", "layer4")

    def __init__(self, params, num_channels, return_interm_layers):
        self.num_channels = num_channels
        if return_interm_layers:
            self.return_layers = {"layer1": "0", "layer2": "1",
                                  "layer3": "2", "layer4": "3"}
        else:
            self.return_layers = {"layer4": "0"}
        # Pack weights once: (Cout, Cin, 3, 3) -> (9, Cin_p, Cout_p) bf16 tap
        # panels (K index = dh*3+dw), with input channels padded to the
        # previous stage's lane-padded width (padded channels are exact zeros)
        # and output channels padded to a lane-dense multiple of 128.
        self.layers = []
        cin_p = params[self.LAYER_ORDER[0]][0].shape[1]   # raw input channels
        for name in self.LAYER_ORDER:
            w, b = params[name]
            cout, cin = w.shape[0], w.shape[1]
            cout_p = _round_up(cout, 128)   # use 256 on v6e/v7x for cout >= 256
            w_mat = jnp.transpose(w, (2, 3, 1, 0)).reshape(9, cin, cout)
            w_mat = jnp.pad(w_mat, ((0, 0), (0, cin_p - cin),
                                    (0, cout_p - cout))).astype(jnp.bfloat16)
            b_vec = jnp.pad(b.astype(jnp.float32),
                            (0, cout_p - cout)).reshape(1, cout_p)
            self.layers.append((name, w_mat, b_vec, cout))
            cin_p = cout_p

    def forward(self, tensor_list: NestedTensor):
        # NCHW -> NHWC + bf16 once; activations flow bf16 and channel-padded
        # between stages; slice / cast / transpose only on returned features.
        x = jnp.transpose(tensor_list.tensors, (0, 2, 3, 1)).astype(jnp.bfloat16)
        feats = {}
        for name, w_mat, b_vec, cout in self.layers:
            x = conv3x3_s2_relu_nhwc(x, w_mat, b_vec)
            if name in self.return_layers:
                f = x[..., :cout].astype(jnp.float32).transpose(0, 3, 1, 2)
                feats[self.return_layers[name]] = f
        out = {}
        for name, f in feats.items():
            m = tensor_list.mask
            assert m is not None
            mask = interpolate_mask_nearest(m, f.shape[-2:])
            out[name] = NestedTensor(f, mask)
        return out


def init_backbone_params(key, c_in=4, widths=(8, 16, 32, 64)):
    params = {}
    cin = c_in
    for i, cout in enumerate(widths):
        key, kw, kb = jax.random.split(key, 3)
        w = jax.random.normal(kw, (cout, cin, 3, 3), jnp.float32) * 0.1
        b = jax.random.normal(kb, (cout,), jnp.float32) * 0.01
        params[f"layer{i + 1}"] = (w, b)
        cin = cout
    return params, cin  # cin == num_channels of layer4


def _conv_ref_f32(x_nchw, w, b):
    """Plain-JAX f32 reference: conv3x3/s2/p1 + bias + ReLU (NCHW)."""
    y = lax.conv_general_dilated(
        x_nchw, w, window_strides=(2, 2), padding=((1, 1), (1, 1)),
        dimension_numbers=("NCHW", "OIHW", "NCHW"))
    return jnp.maximum(y + b[None, :, None, None], 0.0)


if __name__ == "__main__":
    key = jax.random.PRNGKey(0)
    B, C, H, W = 2, 4, 16, 16

    kx, km, kp = jax.random.split(key, 3)
    x = jax.random.normal(kx, (B, C, H, W), jnp.float32)
    # Padding mask: True where padded (like DETR NestedTensor masks).
    mask = jax.random.bernoulli(km, p=0.3, shape=(B, H, W))

    params, num_channels = init_backbone_params(kp, c_in=C)
    backbone = BackboneBase(params, num_channels=num_channels,
                            return_interm_layers=True)

    out = backbone.forward(NestedTensor(x, mask))

    # f32 reference (kernel runs the MXU in bf16 -> loose tolerance).
    ref = x
    ref_feats = {}
    for i, name in enumerate(BackboneBase.LAYER_ORDER):
        w, b = params[name]
        ref = _conv_ref_f32(ref, w, b)
        ref_feats[str(i)] = ref

    for name in sorted(out.keys()):
        feats, m = out[name].decompose()
        jax.block_until_ready(feats)
        jax.block_until_ready(m)
        assert feats.shape == ref_feats[name].shape
        assert m.shape == (B,) + feats.shape[-2:]
        assert m.dtype == jnp.bool_
        assert jnp.all(jnp.isfinite(feats))
        assert jnp.allclose(feats, ref_feats[name], atol=3e-2, rtol=3e-2), name

    print("KERNEL_OK")
</pallas_src>

<mosaic_0001>
module attributes {stable_mosaic.version = 11 : i64} {
  func.func @_conv3x3s2_kernel(%arg0: i32, %arg1: memref<1x72x4xbf16, #tpu.memory_space<vmem>>, %arg2: memref<1x72x4xbf16, #tpu.memory_space<vmem>>, %arg3: memref<1x72x4xbf16, #tpu.memory_space<vmem>>, %arg4: memref<1x64x4xbf16, #tpu.memory_space<vmem>>, %arg5: memref<1x64x4xbf16, #tpu.memory_space<vmem>>, %arg6: memref<1x64x4xbf16, #tpu.memory_space<vmem>>, %arg7: memref<9x4x128xbf16, #tpu.memory_space<vmem>>, %arg8: memref<1x128xf32, #tpu.memory_space<vmem>>, %arg9: memref<1x64x128xbf16, #tpu.memory_space<vmem>>) attributes {dimension_semantics = [#tpu.dimension_semantics<parallel>], iteration_bounds = array<i64: 2>, scalar_prefetch = 0 : i64, scratch_operands = 0 : i64, tpu.core_type = #tpu.core_type<tc>, window_params = [{transform_indices = @transform_0, window_bounds = array<i64: 1, 72, 4>}, {transform_indices = @transform_1, window_bounds = array<i64: 1, 72, 4>}, {transform_indices = @transform_2, window_bounds = array<i64: 1, 72, 4>}, {transform_indices = @transform_3, window_bounds = array<i64: 1, 64, 4>}, {transform_indices = @transform_4, window_bounds = array<i64: 1, 64, 4>}, {transform_indices = @transform_5, window_bounds = array<i64: 1, 64, 4>}, {pipeline_mode = #tpu.pipeline_mode<synchronous>, transform_indices = @transform_6, window_bounds = array<i64: 9, 4, 128>}, {pipeline_mode = #tpu.pipeline_mode<synchronous>, transform_indices = @transform_7, window_bounds = array<i64: 1, 128>}, {transform_indices = @transform_8, window_bounds = array<i64: 1, 64, 128>}]} {
    %cst = arith.constant 0.000000e+00 : f32
    %0 = vector.broadcast %cst : f32 to vector<64x128xf32>
    %c0 = arith.constant 0 : index
    %c0_0 = arith.constant 0 : index
    %c0_1 = arith.constant 0 : index
    %1 = vector.load %arg1[%c0, %c0_0, %c0_1] : memref<1x72x4xbf16, #tpu.memory_space<vmem>>, vector<1x64x4xbf16>
    %2 = vector.shape_cast %1 : vector<1x64x4xbf16> to vector<64x4xbf16>
    %c0_2 = arith.constant 0 : index
    %c0_3 = arith.constant 0 : index
    %c0_4 = arith.constant 0 : index
    %3 = vector.load %arg7[%c0_2, %c0_3, %c0_4] : memref<9x4x128xbf16, #tpu.memory_space<vmem>>, vector<1x4x128xbf16>
    %4 = vector.shape_cast %3 : vector<1x4x128xbf16> to vector<4x128xbf16>
    %cst_5 = arith.constant dense<0.000000e+00> : vector<64x128xf32>
    %5 = tpu.matmul %2, %4, %cst_5 {dimension_numbers = #tpu.dot_dimension_numbers<[1], [0], [0], [1], [0, 0, 1, 1], [], []>} : vector<64x4xbf16>, vector<4x128xbf16>, vector<64x128xf32> -> vector<64x128xf32>
    %6 = arith.addf %0, %5 : vector<64x128xf32>
    %c0_6 = arith.constant 0 : index
    %c0_7 = arith.constant 0 : index
    %c0_8 = arith.constant 0 : index
    %7 = vector.load %arg2[%c0_6, %c0_7, %c0_8] : memref<1x72x4xbf16, #tpu.memory_space<vmem>>, vector<1x64x4xbf16>
    %8 = vector.shape_cast %7 : vector<1x64x4xbf16> to vector<64x4xbf16>
    %c1 = arith.constant 1 : index
    %c0_9 = arith.constant 0 : index
    %c0_10 = arith.constant 0 : index
    %9 = vector.load %arg7[%c1, %c0_9, %c0_10] : memref<9x4x128xbf16, #tpu.memory_space<vmem>>, vector<1x4x128xbf16>
    %10 = vector.shape_cast %9 : vector<1x4x128xbf16> to vector<4x128xbf16>
    %cst_11 = arith.constant dense<0.000000e+00> : vector<64x128xf32>
    %11 = tpu.matmul %8, %10, %cst_11 {dimension_numbers = #tpu.dot_dimension_numbers<[1], [0], [0], [1], [0, 0, 1, 1], [], []>} : vector<64x4xbf16>, vector<4x128xbf16>, vector<64x128xf32> -> vector<64x128xf32>
    %12 = arith.addf %6, %11 : vector<64x128xf32>
    %c0_12 = arith.constant 0 : index
    %c0_13 = arith.constant 0 : index
    %c0_14 = arith.constant 0 : index
    %13 = vector.load %arg3[%c0_12, %c0_13, %c0_14] : memref<1x72x4xbf16, #tpu.memory_space<vmem>>, vector<1x64x4xbf16>
    %14 = vector.shape_cast %13 : vector<1x64x4xbf16> to vector<64x4xbf16>
    %c2 = arith.constant 2 : index
    %c0_15 = arith.constant 0 : index
    %c0_16 = arith.constant 0 : index
    %15 = vector.load %arg7[%c2, %c0_15, %c0_16] : memref<9x4x128xbf16, #tpu.memory_space<vmem>>, vector<1x4x128xbf16>
    %16 = vector.shape_cast %15 : vector<1x4x128xbf16> to vector<4x128xbf16>
    %cst_17 = arith.constant dense<0.000000e+00> : vector<64x128xf32>
    %17 = tpu.matmul %14, %16, %cst_17 {dimension_numbers = #tpu.dot_dimension_numbers<[1], [0], [0], [1], [0, 0, 1, 1], [], []>} : vector<64x4xbf16>, vector<4x128xbf16>, vector<64x128xf32> -> vector<64x128xf32>
    %18 = arith.addf %12, %17 : vector<64x128xf32>
    %c0_18 = arith.constant 0 : index
    %c0_19 = arith.constant 0 : index
    %c0_20 = arith.constant 0 : index
    %19 = vector.load %arg4[%c0_18, %c0_19, %c0_20] : memref<1x64x4xbf16, #tpu.memory_space<vmem>>, vector<1x64x4xbf16>
    %20 = vector.shape_cast %19 : vector<1x64x4xbf16> to vector<64x4xbf16>
    %c3 = arith.constant 3 : index
    %c0_21 = arith.constant 0 : index
    %c0_22 = arith.constant 0 : index
    %21 = vector.load %arg7[%c3, %c0_21, %c0_22] : memref<9x4x128xbf16, #tpu.memory_space<vmem>>, vector<1x4x128xbf16>
    %22 = vector.shape_cast %21 : vector<1x4x128xbf16> to vector<4x128xbf16>
    %cst_23 = arith.constant dense<0.000000e+00> : vector<64x128xf32>
    %23 = tpu.matmul %20, %22, %cst_23 {dimension_numbers = #tpu.dot_dimension_numbers<[1], [0], [0], [1], [0, 0, 1, 1], [], []>} : vector<64x4xbf16>, vector<4x128xbf16>, vector<64x128xf32> -> vector<64x128xf32>
    %24 = arith.addf %18, %23 : vector<64x128xf32>
    %c0_24 = arith.constant 0 : index
    %c0_25 = arith.constant 0 : index
    %c0_26 = arith.constant 0 : index
    %25 = vector.load %arg5[%c0_24, %c0_25, %c0_26] : memref<1x64x4xbf16, #tpu.memory_space<vmem>>, vector<1x64x4xbf16>
    %26 = vector.shape_cast %25 : vector<1x64x4xbf16> to vector<64x4xbf16>
    %c4 = arith.constant 4 : index
    %c0_27 = arith.constant 0 : index
    %c0_28 = arith.constant 0 : index
    %27 = vector.load %arg7[%c4, %c0_27, %c0_28] : memref<9x4x128xbf16, #tpu.memory_space<vmem>>, vector<1x4x128xbf16>
    %28 = vector.shape_cast %27 : vector<1x4x128xbf16> to vector<4x128xbf16>
    %cst_29 = arith.constant dense<0.000000e+00> : vector<64x128xf32>
    %29 = tpu.matmul %26, %28, %cst_29 {dimension_numbers = #tpu.dot_dimension_numbers<[1], [0], [0], [1], [0, 0, 1, 1], [], []>} : vector<64x4xbf16>, vector<4x128xbf16>, vector<64x128xf32> -> vector<64x128xf32>
    %30 = arith.addf %24, %29 : vector<64x128xf32>
    %c0_30 = arith.constant 0 : index
    %c0_31 = arith.constant 0 : index
    %c0_32 = arith.constant 0 : index
    %31 = vector.load %arg6[%c0_30, %c0_31, %c0_32] : memref<1x64x4xbf16, #tpu.memory_space<vmem>>, vector<1x64x4xbf16>
    %32 = vector.shape_cast %31 : vector<1x64x4xbf16> to vector<64x4xbf16>
    %c5 = arith.constant 5 : index
    %c0_33 = arith.constant 0 : index
    %c0_34 = arith.constant 0 : index
    %33 = vector.load %arg7[%c5, %c0_33, %c0_34] : memref<9x4x128xbf16, #tpu.memory_space<vmem>>, vector<1x4x128xbf16>
    %34 = vector.shape_cast %33 : vector<1x4x128xbf16> to vector<4x128xbf16>
    %cst_35 = arith.constant dense<0.000000e+00> : vector<64x128xf32>
    %35 = tpu.matmul %32, %34, %cst_35 {dimension_numbers = #tpu.dot_dimension_numbers<[1], [0], [0], [1], [0, 0, 1, 1], [], []>} : vector<64x4xbf16>, vector<4x128xbf16>, vector<64x128xf32> -> vector<64x128xf32>
    %36 = arith.addf %30, %35 : vector<64x128xf32>
    %c0_36 = arith.constant 0 : index
    %c8 = arith.constant 8 : index
    %c0_37 = arith.constant 0 : index
    %37 = vector.load %arg1[%c0_36, %c8, %c0_37] : memref<1x72x4xbf16, #tpu.memory_space<vmem>>, vector<1x64x4xbf16>
    %38 = vector.shape_cast %37 : vector<1x64x4xbf16> to vector<64x4xbf16>
    %c6 = arith.constant 6 : index
    %c0_38 = arith.constant 0 : index
    %c0_39 = arith.constant 0 : index
    %39 = vector.load %arg7[%c6, %c0_38, %c0_39] : memref<9x4x128xbf16, #tpu.memory_space<vmem>>, vector<1x4x128xbf16>
    %40 = vector.shape_cast %39 : vector<1x4x128xbf16> to vector<4x128xbf16>
    %cst_40 = arith.constant dense<0.000000e+00> : vector<64x128xf32>
    %41 = tpu.matmul %38, %40, %cst_40 {dimension_numbers = #tpu.dot_dimension_numbers<[1], [0], [0], [1], [0, 0, 1, 1], [], []>} : vector<64x4xbf16>, vector<4x128xbf16>, vector<64x128xf32> -> vector<64x128xf32>
    %42 = arith.addf %36, %41 : vector<64x128xf32>
    %c0_41 = arith.constant 0 : index
    %c8_42 = arith.constant 8 : index
    %c0_43 = arith.constant 0 : index
    %43 = vector.load %arg2[%c0_41, %c8_42, %c0_43] : memref<1x72x4xbf16, #tpu.memory_space<vmem>>, vector<1x64x4xbf16>
    %44 = vector.shape_cast %43 : vector<1x64x4xbf16> to vector<64x4xbf16>
    %c7 = arith.constant 7 : index
    %c0_44 = arith.constant 0 : index
    %c0_45 = arith.constant 0 : index
    %45 = vector.load %arg7[%c7, %c0_44, %c0_45] : memref<9x4x128xbf16, #tpu.memory_space<vmem>>, vector<1x4x128xbf16>
    %46 = vector.shape_cast %45 : vector<1x4x128xbf16> to vector<4x128xbf16>
    %cst_46 = arith.constant dense<0.000000e+00> : vector<64x128xf32>
    %47 = tpu.matmul %44, %46, %cst_46 {dimension_numbers = #tpu.dot_dimension_numbers<[1], [0], [0], [1], [0, 0, 1, 1], [], []>} : vector<64x4xbf16>, vector<4x128xbf16>, vector<64x128xf32> -> vector<64x128xf32>
    %48 = arith.addf %42, %47 : vector<64x128xf32>
    %c0_47 = arith.constant 0 : index
    %c8_48 = arith.constant 8 : index
    %c0_49 = arith.constant 0 : index
    %49 = vector.load %arg3[%c0_47, %c8_48, %c0_49] : memref<1x72x4xbf16, #tpu.memory_space<vmem>>, vector<1x64x4xbf16>
    %50 = vector.shape_cast %49 : vector<1x64x4xbf16> to vector<64x4xbf16>
    %c8_50 = arith.constant 8 : index
    %c0_51 = arith.constant 0 : index
    %c0_52 = arith.constant 0 : index
    %51 = vector.load %arg7[%c8_50, %c0_51, %c0_52] : memref<9x4x128xbf16, #tpu.memory_space<vmem>>, vector<1x4x128xbf16>
    %52 = vector.shape_cast %51 : vector<1x4x128xbf16> to vector<4x128xbf16>
    %cst_53 = arith.constant dense<0.000000e+00> : vector<64x128xf32>
    %53 = tpu.matmul %50, %52, %cst_53 {dimension_numbers = #tpu.dot_dimension_numbers<[1], [0], [0], [1], [0, 0, 1, 1], [], []>} : vector<64x4xbf16>, vector<4x128xbf16>, vector<64x128xf32> -> vector<64x128xf32>
    %54 = arith.addf %48, %53 : vector<64x128xf32>
    %c0_54 = arith.constant 0 : index
    %c0_55 = arith.constant 0 : index
    %55 = vector.load %arg8[%c0_54, %c0_55] : memref<1x128xf32, #tpu.memory_space<vmem>>, vector<1x128xf32>
    %56 = vector.broadcast %55 : vector<1x128xf32> to vector<64x128xf32>
    %57 = arith.addf %54, %56 : vector<64x128xf32>
    %cst_56 = arith.constant 0.000000e+00 : f32
    %58 = vector.broadcast %cst_56 : f32 to vector<64x128xf32>
    %59 = arith.maximumf %57, %58 : vector<64x128xf32>
    %60 = arith.truncf %59 : vector<64x128xf32> to vector<64x128xbf16>
    %c0_57 = arith.constant 0 : index
    %c0_58 = arith.constant 0 : index
    %c0_59 = arith.constant 0 : index
    %61 = vector.load %arg9[%c0_57, %c0_58, %c0_59] : memref<1x64x128xbf16, #tpu.memory_space<vmem>>, vector<1x64x128xbf16>
    %62 = vector.shape_cast %61 : vector<1x64x128xbf16> to vector<64x128xbf16>
    %63 = vector.shape_cast %60 : vector<64x128xbf16> to vector<1x64x128xbf16>
    tpu.vector_store %arg9[%c0_57, %c0_58, %c0_59], %63 {strides = array<i32>} : memref<1x64x128xbf16, #tpu.memory_space<vmem>>, vector<1x64x128xbf16>,
    return
  }
  func.func @transform_0(%arg0: i32) -> (i32, i32, i32) {
    %c0_i32 = arith.constant 0 : i32
    %c0_i32_0 = arith.constant 0 : i32
    %c0_i32_1 = arith.constant 0 : i32
    return %arg0, %c0_i32, %c0_i32_0 : i32, i32, i32
  }
  func.func @transform_1(%arg0: i32) -> (i32, i32, i32) {
    %c0_i32 = arith.constant 0 : i32
    %c0_i32_0 = arith.constant 0 : i32
    %c0_i32_1 = arith.constant 0 : i32
    return %arg0, %c0_i32, %c0_i32_0 : i32, i32, i32
  }
  func.func @transform_2(%arg0: i32) -> (i32, i32, i32) {
    %c0_i32 = arith.constant 0 : i32
    %c0_i32_0 = arith.constant 0 : i32
    %c0_i32_1 = arith.constant 0 : i32
    return %arg0, %c0_i32, %c0_i32_0 : i32, i32, i32
  }
  func.func @transform_3(%arg0: i32) -> (i32, i32, i32) {
    %c0_i32 = arith.constant 0 : i32
    %c0_i32_0 = arith.constant 0 : i32
    %c0_i32_1 = arith.constant 0 : i32
    return %arg0, %c0_i32, %c0_i32_0 : i32, i32, i32
  }
  func.func @transform_4(%arg0: i32) -> (i32, i32, i32) {
    %c0_i32 = arith.constant 0 : i32
    %c0_i32_0 = arith.constant 0 : i32
    %c0_i32_1 = arith.constant 0 : i32
    return %arg0, %c0_i32, %c0_i32_0 : i32, i32, i32
  }
  func.func @transform_5(%arg0: i32) -> (i32, i32, i32) {
    %c0_i32 = arith.constant 0 : i32
    %c0_i32_0 = arith.constant 0 : i32
    %c0_i32_1 = arith.constant 0 : i32
    return %arg0, %c0_i32, %c0_i32_0 : i32, i32, i32
  }
  func.func @transform_6(%arg0: i32) -> (i32, i32, i32) {
    %c0_i32 = arith.constant 0 : i32
    %c0_i32_0 = arith.constant 0 : i32
    %c0_i32_1 = arith.constant 0 : i32
    %c0_i32_2 = arith.constant 0 : i32
    return %c0_i32, %c0_i32_0, %c0_i32_1 : i32, i32, i32
  }
  func.func @transform_7(%arg0: i32) -> (i32, i32) {
    %c0_i32 = arith.constant 0 : i32
    %c0_i32_0 = arith.constant 0 : i32
    %c0_i32_1 = arith.constant 0 : i32
    return %c0_i32, %c0_i32_0 : i32, i32
  }
  func.func @transform_8(%arg0: i32) -> (i32, i32, i32) {
    %c0_i32 = arith.constant 0 : i32
    %c0_i32_0 = arith.constant 0 : i32
    %c0_i32_1 = arith.constant 0 : i32
    return %arg0, %c0_i32, %c0_i32_0 : i32, i32, i32
  }
}

</mosaic_0001>

<bundles_post_ra>
// kernel: tpu_custom_call.1
= control target key start
LH: loop header
LB: loop body
LE: loop exit
PB: predicated region body
PF: predicated region fallthrough
CT: control target
= control target key end

     0   :  { %s2011_s0 = inlined_call_operand.vmem [shape: bf16[2,72,4], index: 0, kind: input, shape index: {}]   ;;  %s2012_s1 = inlined_call_operand.vmem [shape: bf16[2,72,4], index: 1, kind: input, shape index: {}]   ;;  %s2013_s2 = inlined_call_operand.vmem [shape: bf16[2,72,4], index: 2, kind: input, shape index: {}]   ;;  %s2014_s3 = inlined_call_operand.vmem [shape: bf16[2,64,4], index: 3, kind: input, shape index: {}]   ;;  %s2015_s4 = inlined_call_operand.vmem [shape: bf16[2,64,4], index: 4, kind: input, shape index: {}]   ;;  %s2016_s5 = inlined_call_operand.vmem [shape: bf16[2,64,4], index: 5, kind: input, shape index: {}]   ;;  %s2017_s6 = inlined_call_operand.vmem [shape: bf16[9,4,128], index: 6, kind: input, shape index: {}]   ;;  %s2018_s7 = inlined_call_operand.vmem [shape: f32[1,128], index: 7, kind: input, shape index: {}]   ;;  %s2019_s8 = inlined_call_operand.hbm [shape: bf16[2,64,128], index: 8, kind: output, shape index: {}]  }
   0x1   :  { %2020 = sst [smem:[#allocation5_spill]] %s2012_s1 }
   0x2   :  { %13 = vsyncpa [#allocation3], 0 }
   0x3   :  { %15 = vsyncpa [#allocation3 + $0x1], 0  ;;  %s1729_s27 = smov 0   ;;  %s1731_s28 = smov 0  }
   0x4   :  { %s1733_s29 = smov 0   ;;  %s1735_s30 = smov 0  }
   0x5 LB: > { %s1750_s9 = sadd.s32 4294967295, %s1680_s30   ;;  %s1302_s10 = sadd.s32 4294967294, %s1680_s30   ;;  %s1680_s30 = sphi %s1735_s30, %s2027_s30   ;;  %s1676_s29 = sphi %s1733_s29, %s2026_s29   ;;  %s1672_s28 = sphi %s1731_s28, %s2025_s28   ;;  %s1668_s27 = sphi %s1729_s27, %s2024_s27  }
   0x6   : > { %s1754_s11 = sadd.s32 1, %s1680_s30   ;;  %s226_s12 = sadd.s32 1, %s1676_s29 }
   0x7   : > { %s223_s13 = ssub.s32 %s1680_s30, %s1754_s11  ;;  %p236_p0 = scmp.ne.s32.totalorder %s1676_s29, %s1672_s28 }
   0x8   : > { %p224_p1 = scmp.eq.s32.totalorder %s223_s13, 0  ;;  %p237_p2 = scmp.eq.s32.totalorder %s1750_s9, 1 }
   0x9   : > { %p242_p3 = scmp.ne.s32.totalorder %s1672_s28, %s1668_s27  ;;  %p243_p4 = scmp.eq.s32.totalorder %s1302_s10, 1 }
   0xa   : > { %s1765_s14 = scalar_select %p224_p1, %s1676_s29, %s226_s12  }
   0xb   : > { %p1767_p5 = por %p237_p2, %p236_p0  ;;  %p1771_p6 = por %p243_p4, %p242_p3 }
   0xc   : > { %p1305_p7 = scmp.ge.s32.totalorder %s1680_s30, 1  ;;  %p315_p8 = scmp.lt.s32.totalorder %s1680_s30, 3 }
   0xe   : > { %p316_p9 = pnand %p1305_p7, %p315_p8 }
   0xf   : > { %p374_p10 = scmp.lt.s32.totalorder (!%p316_p9), %s1750_s9, 1  ;;  %s2023_s1 = sld [smem:[#allocation5_spill]] (!%p316_p9) }
  0x10   : > { %319 = sbr.rel (%p316_p9) target bundleno = 313 (0x139), region = 52 }
  0x15   : > { %v1316_v0 = vld [vmem:[%s2017_s6 + $0x2] sm:$0x3]  ;;  %vm457_vm0 = vcmask 1041408   ;;  %v1357_v2 = vld [vmem:[%s2017_s6 + $0x4] sm:$0x3]  ;;  %s1789_s23 = scalar_select %p374_p10, %s1750_s9, 1 }
  0x16   : > { %v459_v1 = vsel %vm457_vm0, %v1316_v0, 0  ;;  %v1378_v3 = vld [vmem:[%s2017_s6 + $0x6] sm:$0x3]  ;;  %v597_v4 = vsel %vm457_vm0, %v1357_v2, 0  ;;  %v413_v6 = vld [vmem:[%s2017_s6] sm:$0x3] }
  0x17   : > { %1572 = vmatpush.bf16.msra.mxu1 %v459_v1  ;;  %1573 = vmatpush.bf16.msra.mxu2 %v459_v1  ;;  %v679_v5 = vsel %vm457_vm0, %v1378_v3, 0  ;;  %v523_v7 = vsel %vm457_vm0, %v413_v6, 0  ;;  %v1399_v8 = vld [vmem:[%s2017_s6 + $0x8] sm:$0x3]  ;;  %s1801_s12 = smul.u32 36, %s1789_s23  ;;  %vm444_vm1 = vcmask 31744  }
  0x18   : > { %1574 = vmatpush.bf16.msra.mxu3 %v459_v1  ;;  %468 = vmatpush.bf16.msra.mxu0 %v459_v1  ;;  %v761_v9 = vsel %vm457_vm0, %v1399_v8, 0  ;;  %v1441_v10 = vld [vmem:[%s2017_s6 + $0xc] sm:$0x3]  ;;  %v1462_v11 = vld [vmem:[%s2017_s6 + $0xe] sm:$0x3]  ;;  %s1835_s13 = sshll.u32 %s1789_s23, 5 }
  0x19   : > { %s1814_s22 = scalar_lea.vmem %s2023_s1, %s1801_s12  ;;  %v1420_v12 = vld [vmem:[%s2017_s6 + $0xa] sm:$0x3]  ;;  %v1483_v13 = vld [vmem:[%s2017_s6 + $0x10] sm:$0x3]  ;;  %v925_v18 = vsel %vm457_vm0, %v1441_v10, 0  ;;  %v1007_v19 = vsel %vm457_vm0, %v1462_v11, 0  ;;  %s1841_s19 = scalar_lea.vmem %s2011_s0, %s1801_s12 }
  0x1a   : > { %v1517_v14 = vld [vmem:[%s1814_s22 + $0x8] sm:$0xff]  ;;  %v1518_v15 = vld [vmem:[%s1814_s22 + $0x10] sm:$0xff]  ;;  %v1519_v16 = vld [vmem:[%s1814_s22 + $0x18] sm:$0xff]  ;;  %v843_v20 = vsel %vm457_vm0, %v1420_v12, 0  ;;  %v1089_v21 = vsel %vm457_vm0, %v1483_v13, 0  ;;  %s1847_s24 = scalar_lea.vmem %s2013_s2, %s1801_s12  ;;  %s393_s23 = scalar_lea.vmem %s2014_s3, %s1835_s13 }
  0x1b   : > { %606 = vmatpush.bf16.msrb.mxu2 %v597_v4  ;;  %532 = vmatpush.bf16.msrb.mxu1 %v523_v7  ;;  %v1516_v17 = vld [vmem:[%s1814_s22] sm:$0xff]  ;;  %s398_s17 = scalar_lea.vmem %s2015_s4, %s1835_s13  ;;  %v1513_v26 = vld [vmem:[%s1841_s19 + $0x8] sm:$0xff]  ;;  %v1514_v30 = vld [vmem:[%s1841_s19 + $0x10] sm:$0xff]  ;;  %s403_s18 = scalar_lea.vmem %s2016_s5, %s1835_s13 }
  0x1c   : > { %688 = vmatpush.bf16.msrb.mxu3 %v679_v5  ;;  %770 = vmatpush.bf16.msrb.mxu0 %v761_v9  ;;  %v1512_v22 = vld [vmem:[%s1841_s19] sm:$0xff]  ;;  %v1521_v27 = vld [vmem:[%s1847_s24 + $0x8] sm:$0xff]  ;;  %v1522_v31 = vld [vmem:[%s1847_s24 + $0x10] sm:$0xff]  ;;  %s1638_s13 = scalar_lea.hbm %s2019_s8, 64 }
  0x1d   : > { %1334 = vmatmul.msk.bf16.vlgmr.msra.gmra.mxu1 %vm444_vm1, %v1517_v14  ;;  %1335 = vmatmul.msk.bf16.vlgmr.msra.gmra.mxu2 %vm444_vm1, %v1518_v15  ;;  %v1520_v23 = vld [vmem:[%s1847_s24] sm:$0xff]  ;;  %v1525_v28 = vld [vmem:[%s393_s23 + $0x8] sm:$0xff]  ;;  %v1526_v32 = vld [vmem:[%s393_s23 + $0x10] sm:$0xff] }
  0x1e   : > { %1336 = vmatmul.msk.bf16.vlgmr.msra.gmra.mxu3 %vm444_vm1, %v1519_v16  ;;  %1333 = vmatmul.msk.bf16.vlgmr.msra.gmra.mxu0 %vm444_vm1, %v1516_v17  ;;  %v1524_v24 = vld [vmem:[%s393_s23] sm:$0xff]  ;;  %v1529_v29 = vld [vmem:[%s398_s17 + $0x8] sm:$0xff]  ;;  %v1530_v33 = vld [vmem:[%s398_s17 + $0x10] sm:$0xff] }
  0x1f   : > { %934 = vmatpush.bf16.msra.mxu2 %v925_v18  ;;  %852 = vmatpush.bf16.msra.mxu1 %v843_v20  ;;  %v1528_v25 = vld [vmem:[%s398_s17] sm:$0xff]  ;;  %v1515_v34 = vld [vmem:[%s1841_s19 + $0x18] sm:$0xff]  ;;  %v1533_v42 = vld [vmem:[%s403_s18 + $0x8] sm:$0xff] }
  0x20   : > { %1016 = vmatpush.bf16.msra.mxu3 %v1007_v19  ;;  %1098 = vmatpush.bf16.msra.mxu0 %v1089_v21  ;;  %v1523_v35 = vld [vmem:[%s1847_s24 + $0x18] sm:$0xff]  ;;  %v1532_v38 = vld [vmem:[%s403_s18] sm:$0xff]  ;;  %v1537_v43 = vld [vmem:[%s1841_s19 + $0xc] sm:$0xff] }
  0x21   : > { %v1527_v36 = vld [vmem:[%s393_s23 + $0x18] sm:$0xff]  ;;  %v1536_v39 = vld [vmem:[%s1841_s19 + $0x4] sm:$0xff]  ;;  %v1541_v44 = vld [vmem:[%s1814_s22 + $0xc] sm:$0xff] }
  0x22   : > { %v1531_v37 = vld [vmem:[%s398_s17 + $0x18] sm:$0xff]  ;;  %v1540_v40 = vld [vmem:[%s1814_s22 + $0x4] sm:$0xff]  ;;  %v1545_v45 = vld [vmem:[%s1847_s24 + $0xc] sm:$0xff] }
  0x23   : > { %v1544_v41 = vld [vmem:[%s1847_s24 + $0x4] sm:$0xff]  ;;  %v1534_v46 = vld [vmem:[%s403_s18 + $0x10] sm:$0xff]  ;;  %v1535_v50 = vld [vmem:[%s403_s18 + $0x18] sm:$0xff] }
  0x24   : > { %v1538_v47 = vld [vmem:[%s1841_s19 + $0x14] sm:$0xff]  ;;  %v1539_v51 = vld [vmem:[%s1841_s19 + $0x1c] sm:$0xff]  ;;  %s371_s19 = sand.u32 1, %s1672_s28  }
  0x25   : > { %v1542_v48 = vld [vmem:[%s1814_s22 + $0x14] sm:$0xff]  ;;  %v1543_v53 = vld [vmem:[%s1814_s22 + $0x1c] sm:$0xff]  ;;  %s1306_s20 = sshll.u32 %s371_s19, 5 }
  0x26   : > { %v1546_v49 = vld [vmem:[%s1847_s24 + $0x14] sm:$0xff]  ;;  %v1547_v54 = vld [vmem:[%s1847_s24 + $0x1c] sm:$0xff]  ;;  %s1952_s21 = scalar_lea.vmem [#allocation2], %s1306_s20  ;;  %s1548_s24 = sshll.u32 %s1750_s9, 5 }
  0x27   : > { %s1176_s23 = scalar_lea.hbm %s2019_s8, %s1548_s24  ;;  %s1177_s10 = sshll.u32 %s1952_s21, 4  ;;  %s1178_s10 = int_to_ptr.vmem [resolvable:$true] %s1177_s10 }
  0x28   : > { %s1179_s17 = sshll.u32 %s1176_s23, 4  ;;  %s1165_s9 = scalar_lea.sflag [#allocation3], %s371_s19  ;;  %s1180_s17 = int_to_ptr.hbm [resolvable:$true] %s1179_s17 }
  0x29   : > { %s1632_s1 = sshra.s32 %s1180_s17, 4  ;;  %s1633_s1 = int_to_ptr.hbm [resolvable:$true] %s1632_s1 }
  0x2a   : > { %s1634_s12 = scalar_lea.hbm %s1633_s1, 32  ;;  %p1639_p0 = scmp.lt.s32.totalorder %s1633_s1, %s2019_s8 }
  0x2b   : > { %p1635_p11 = scmp.ne.s32.totalorder %s1633_s1, %s1634_s12  ;;  %p1640_p1 = scmp.lt.s32.totalorder %s1638_s13, %s1634_s12 }
  0x2d   : > { %1353 = vmatmul.msk.bf16.vlgmr.msrb.gmra.mxu1 %vm444_vm1, %v1512_v22  ;;  %1374 = vmatmul.msk.bf16.vlgmr.msrb.gmra.mxu2 %vm444_vm1, %v1520_v23  ;;  %p1636_p12 = pnand %p1635_p11, %p1767_p5  ;;  %p1641_p2 = por %p1640_p1, %p1639_p0 }
  0x2e   : > { %1395 = vmatmul.msk.bf16.vlgmr.msrb.gmra.mxu3 %vm444_vm1, %v1524_v24  ;;  %1416 = vmatmul.msk.bf16.vlgmr.msrb.gmra.mxu0 %vm444_vm1, %v1528_v25 }
  0x2f   : > { %p1637_p13 = pneg %p1636_p12 }
  0x31   : > { %p1642_p3 = pnand %p1641_p2, %p1637_p13 }
  0x3d   : > { %1354 = vmatmul.msk.bf16.gmra.mxu1 %vm444_vm1, %v1513_v26  ;;  %1375 = vmatmul.msk.bf16.gmra.mxu2 %vm444_vm1, %v1521_v27 }
  0x3e   : > { %1396 = vmatmul.msk.bf16.gmra.mxu3 %vm444_vm1, %v1525_v28  ;;  %1417 = vmatmul.msk.bf16.gmra.mxu0 %vm444_vm1, %v1529_v29 }
  0x4d   : > { %1355 = vmatmul.msk.bf16.gmra.mxu1 %vm444_vm1, %v1514_v30  ;;  %1376 = vmatmul.msk.bf16.gmra.mxu2 %vm444_vm1, %v1522_v31 }
  0x4e   : > { %1397 = vmatmul.msk.bf16.gmra.mxu3 %vm444_vm1, %v1526_v32  ;;  %1418 = vmatmul.msk.bf16.gmra.mxu0 %vm444_vm1, %v1530_v33 }
  0x5d   : > { %1356 = vmatmul.msk.bf16.gmra.mxu1 %vm444_vm1, %v1515_v34  ;;  %1377 = vmatmul.msk.bf16.gmra.mxu2 %vm444_vm1, %v1523_v35 }
  0x5e   : > { %1398 = vmatmul.msk.bf16.gmra.mxu3 %vm444_vm1, %v1527_v36  ;;  %1419 = vmatmul.msk.bf16.gmra.mxu0 %vm444_vm1, %v1531_v37 }
  0x6d   : > { %1437 = vmatmul.msk.bf16.vlgmr.msra.gmra.mxu1 %vm444_vm1, %v1532_v38  ;;  %1458 = vmatmul.msk.bf16.vlgmr.msra.gmra.mxu2 %vm444_vm1, %v1536_v39 }
  0x6e   : > { %1479 = vmatmul.msk.bf16.vlgmr.msra.gmra.mxu3 %vm444_vm1, %v1540_v40  ;;  %1500 = vmatmul.msk.bf16.vlgmr.msra.gmra.mxu0 %vm444_vm1, %v1544_v41 }
  0x7d   : > { %1438 = vmatmul.msk.bf16.gmra.mxu1 %vm444_vm1, %v1533_v42  ;;  %1459 = vmatmul.msk.bf16.gmra.mxu2 %vm444_vm1, %v1537_v43 }
  0x7e   : > { %1480 = vmatmul.msk.bf16.gmra.mxu3 %vm444_vm1, %v1541_v44  ;;  %1501 = vmatmul.msk.bf16.gmra.mxu0 %vm444_vm1, %v1545_v45 }
  0x8d   : > { %1439 = vmatmul.msk.bf16.gmra.mxu1 %vm444_vm1, %v1534_v46  ;;  %1460 = vmatmul.msk.bf16.gmra.mxu2 %vm444_vm1, %v1538_v47 }
  0x8e   : > { %1481 = vmatmul.msk.bf16.gmra.mxu3 %vm444_vm1, %v1542_v48  ;;  %1502 = vmatmul.msk.bf16.gmra.mxu0 %vm444_vm1, %v1546_v49 }
  0x9a   : > { %v475_v52 = vpop.f32.mrf.mxu1 }
  0x9b   : > { %v470_v55 = vpop.f32.mrf.mxu0 }
  0x9d   : > { %1440 = vmatmul.msk.bf16.gmra.mxu1 %vm444_vm1, %v1535_v50  ;;  %1461 = vmatmul.msk.bf16.gmra.mxu2 %vm444_vm1, %v1539_v51 }
  0x9e   : > { %1482 = vmatmul.msk.bf16.gmra.mxu3 %vm444_vm1, %v1543_v53  ;;  %1503 = vmatmul.msk.bf16.gmra.mxu0 %vm444_vm1, %v1547_v54 }
  0xa0   : > { %v480_v56 = vpop.f32.mrf.mxu2 }
  0xa1   : > { %v485_v57 = vpop.f32.mrf.mxu3 }
  0xa2   : > { %v1913_v58 = vpop.f32.mrf.mxu1 }
  0xa3   : > { %v472_v59 = vpop.f32.mrf.mxu0 }
  0xa8   : > { %v1915_v60 = vpop.f32.mrf.mxu2 }
  0xa9   : > { %v1917_v61 = vpop.f32.mrf.mxu3 }
  0xaa   : > { %v534_v62 = vpop.f32.mrf.mxu1 }
  0xab   : > { %v535_v63 = vadd.f32 %v534_v62, %v470_v55  ;;  %v772_v0 = vpop.f32.mrf.mxu0 }
  0xb0   : > { %v608_v1 = vpop.f32.mrf.mxu2 }
  0xb1   : > { %v628_v2 = vadd.f32 %v608_v1, %v535_v63  ;;  %v690_v3 = vpop.f32.mrf.mxu3 }
  0xb2   : > { %v536_v4 = vpop.f32.mrf.mxu1 }
  0xb3   : > { %v710_v5 = vadd.f32 %v690_v3, %v628_v2  ;;  %v774_v6 = vpop.f32.mrf.mxu0  ;;  %v537_v47 = vadd.f32 %v536_v4, %v472_v59  ;;  %v1944_v59 = vld [vmem:[%s2018_s7] ss:$0 sm:$0xff] }
  0xb5   : > { %v792_v7 = vadd.f32 %v772_v0, %v710_v5 }
  0xb8   : > { %v610_v8 = vpop.f32.mrf.mxu2 }
  0xb9   : > { %v692_v9 = vpop.f32.mrf.mxu3  ;;  %v629_v49 = vadd.f32 %v610_v8, %v537_v47 }
  0xba   : > { %v539_v10 = vpop.f32.mrf.mxu1 }
  0xbb   : > { %v540_v11 = vadd.f32 %v539_v10, %v475_v52  ;;  %v777_v12 = vpop.f32.mrf.mxu0  ;;  %v711_v52 = vadd.f32 %v692_v9, %v629_v49 }
  0xbd   : > { %v793_v62 = vadd.f32 %v774_v6, %v711_v52 }
  0xc0   : > { %v613_v13 = vpop.f32.mrf.mxu2 }
  0xc1   : > { %v630_v14 = vadd.f32 %v613_v13, %v540_v11  ;;  %v695_v15 = vpop.f32.mrf.mxu3 }
  0xc2   : > { %v541_v16 = vpop.f32.mrf.mxu1 }
  0xc3   : > { %v712_v17 = vadd.f32 %v695_v15, %v630_v14  ;;  %v1919_v18 = vpop.f32.mrf.mxu0  ;;  %v542_v5 = vadd.f32 %v541_v16, %v1913_v58 }
  0xc5   : > { %v794_v19 = vadd.f32 %v777_v12, %v712_v17 }
  0xc8   : > { %v615_v20 = vpop.f32.mrf.mxu2 }
  0xc9   : > { %v697_v21 = vpop.f32.mrf.mxu3  ;;  %v631_v9 = vadd.f32 %v615_v20, %v542_v5 }
  0xca   : > { %v544_v22 = vpop.f32.mrf.mxu1 }
  0xcb   : > { %v545_v23 = vadd.f32 %v544_v22, %v480_v56  ;;  %v782_v24 = vpop.f32.mrf.mxu0  ;;  %v713_v14 = vadd.f32 %v697_v21, %v631_v9 }
  0xd0   : > { %v618_v25 = vpop.f32.mrf.mxu2 }
  0xd1   : > { %v632_v26 = vadd.f32 %v618_v25, %v545_v23  ;;  %v700_v27 = vpop.f32.mrf.mxu3  ;;  %v795_v25 = vadd.f32 %v1919_v18, %v713_v14 }
  0xd2   : > { %v1921_v28 = vpop.f32.mrf.mxu1 }
  0xd3   : > { %v714_v29 = vadd.f32 %v700_v27, %v632_v26  ;;  %v1923_v30 = vpop.f32.mrf.mxu0 }
  0xd5   : > { %v1925_v31 = vadd.f32 %v782_v24, %v714_v29 }
  0xd8   : > { %v1927_v32 = vpop.f32.mrf.mxu2 }
  0xd9   : > { %v1929_v33 = vpop.f32.mrf.mxu3 }
  0xda   : > { %v549_v34 = vpop.f32.mrf.mxu1 }
  0xdb   : > { %v550_v35 = vadd.f32 %v549_v34, %v485_v57  ;;  %v787_v36 = vpop.f32.mrf.mxu0 }
  0xe0   : > { %v623_v37 = vpop.f32.mrf.mxu2 }
  0xe1   : > { %v634_v38 = vadd.f32 %v623_v37, %v550_v35  ;;  %v705_v39 = vpop.f32.mrf.mxu3  ;;  %v547_v35 = vadd.f32 %v1921_v28, %v1915_v60 }
  0xe2   : > { %v1931_v40 = vpop.f32.mrf.mxu1 }
  0xe3   : > { %v716_v41 = vadd.f32 %v705_v39, %v634_v38  ;;  %v1933_v42 = vpop.f32.mrf.mxu0  ;;  %v633_v37 = vadd.f32 %v1927_v32, %v547_v35 }
  0xe5   : > { %v1935_v43 = vadd.f32 %v787_v36, %v716_v41 }
  0xe8   : > { %v1937_v44 = vpop.f32.mrf.mxu2 }
  0xe9   : > { %v1939_v45 = vpop.f32.mrf.mxu3 }
  0xea   : > { %v854_v46 = vpop.f32.mrf.mxu1 }
  0xeb   : > { %v1100_v48 = vpop.f32.mrf.mxu0  ;;  %v874_v50 = vadd.f32 %v854_v46, %v792_v7 }
  0xf0   : > { %v936_v51 = vpop.f32.mrf.mxu2 }
  0xf1   : > { %v956_v53 = vadd.f32 %v936_v51, %v874_v50  ;;  %v1018_v54 = vpop.f32.mrf.mxu3 }
  0xf2   : > { %v856_v55 = vpop.f32.mrf.mxu1 }
  0xf3   : > { %v1102_v56 = vpop.f32.mrf.mxu0  ;;  %v1038_v57 = vadd.f32 %v1018_v54, %v956_v53  ;;  %v875_v63 = vadd.f32 %v856_v55, %v793_v62 }
  0xf5   : > { %v1120_v1 = vadd.f32 %v1100_v48, %v1038_v57  ;;  %v715_v48 = vadd.f32 %v1929_v33, %v633_v37  ;;  %v552_v33 = vadd.f32 %v1931_v40, %v1917_v61 }
  0xf7   : > { %v1132_v10 = vadd.f32 %v1944_v59, %v1120_v1  ;;  %v797_v32 = vadd.f32 %v1923_v30, %v715_v48  ;;  %v635_v1 = vadd.f32 %v1937_v44, %v552_v33 }
  0xf8   : > { %v938_v0 = vpop.f32.mrf.mxu2 }
  0xf9   : > { %v957_v2 = vadd.f32 %v938_v0, %v875_v63  ;;  %v1020_v3 = vpop.f32.mrf.mxu3  ;;  %v1140_v15 = vmax.f32 %v1132_v10, 0.0 }
  0xfa   : > { %v859_v4 = vpop.f32.mrf.mxu1 }
  0xfb   : > { %v1039_v7 = vadd.f32 %v1020_v3, %v957_v2  ;;  %v1105_v8 = vpop.f32.mrf.mxu0  ;;  %v876_v12 = vadd.f32 %v859_v4, %v794_v19 }
  0xfd   : > { %v1121_v6 = vadd.f32 %v1102_v56, %v1039_v7  ;;  %v717_v7 = vadd.f32 %v1939_v45, %v635_v1 }
  0xff   : > { %v1133_v11 = vadd.f32 %v1944_v59, %v1121_v6 }
 0x100   : > { %v941_v13 = vpop.f32.mrf.mxu2 }
 0x101   : > { %v1141_v17 = vmax.f32 %v1133_v11, 0.0  ;;  %v958_v22 = vadd.f32 %v941_v13, %v876_v12  ;;  %v1023_v23 = vpop.f32.mrf.mxu3  ;;  %v799_v12 = vadd.f32 %v1933_v42, %v717_v7 }
 0x102   : > { %v861_v24 = vpop.f32.mrf.mxu1 }
 0x103   : > { %v1552_v58 = vpack.c.bf16 %v1141_v17, %v1140_v15  ;;  %v1107_v16 = vpop.f32.mrf.mxu0  ;;  %v1040_v20 = vadd.f32 %v1023_v23, %v958_v22  ;;  %v877_v26 = vadd.f32 %v861_v24, %v795_v25 }
 0x105   : > { %1553 = vst [vmem:[%s1952_s21] sm:$0xff] %v1552_v58   ;;  %v1122_v29 = vadd.f32 %v1105_v8, %v1040_v20 }
 0x107   : > { %v1134_v38 = vadd.f32 %v1944_v59, %v1122_v29 }
 0x108   : > { %v943_v27 = vpop.f32.mrf.mxu2 }
 0x109   : > { %v959_v19 = vadd.f32 %v943_v27, %v877_v26  ;;  %v1025_v34 = vpop.f32.mrf.mxu3  ;;  %v1142_v49 = vmax.f32 %v1134_v38, 0.0 }
 0x10a   : > { %v864_v21 = vpop.f32.mrf.mxu1 }
 0x10b   : > { %v1041_v36 = vadd.f32 %v1025_v34, %v959_v19  ;;  %v1110_v41 = vpop.f32.mrf.mxu0  ;;  %v878_v18 = vadd.f32 %v864_v21, %v1925_v31 }
 0x10d   : > { %v1123_v39 = vadd.f32 %v1107_v16, %v1041_v36 }
 0x10f   : > { %v1135_v46 = vadd.f32 %v1944_v59, %v1123_v39 }
 0x110   : > { %v946_v47 = vpop.f32.mrf.mxu2 }
 0x111   : > { %v1143_v50 = vmax.f32 %v1135_v46, 0.0  ;;  %v960_v51 = vadd.f32 %v946_v47, %v878_v18  ;;  %v1028_v52 = vpop.f32.mrf.mxu3 }
 0x112   : > { %v866_v60 = vpop.f32.mrf.mxu1 }
 0x113   : > { %v1557_v28 = vpack.c.bf16 %v1143_v50, %v1142_v49  ;;  %v1042_v53 = vadd.f32 %v1028_v52, %v960_v51  ;;  %v879_v54 = vadd.f32 %v866_v60, %v797_v32  ;;  %v1112_v55 = vpop.f32.mrf.mxu0 }
 0x115   : > { %1569 = vst [vmem:[%s1952_s21 + $0x8] sm:$0xff] %v1557_v28   ;;  %v1124_v57 = vadd.f32 %v1110_v41, %v1042_v53 }
 0x117   : > { %v1136_v2 = vadd.f32 %v1944_v59, %v1124_v57 }
 0x118   : > { %v948_v56 = vpop.f32.mrf.mxu2 }
 0x119   : > { %v961_v62 = vadd.f32 %v948_v56, %v879_v54  ;;  %v1030_v63 = vpop.f32.mrf.mxu3  ;;  %v1144_v8 = vmax.f32 %v1136_v2, 0.0 }
 0x11a   : > { %v869_v31 = vpop.f32.mrf.mxu1 }
 0x11b   : > { %v1043_v0 = vadd.f32 %v1030_v63, %v961_v62  ;;  %v880_v30 = vadd.f32 %v869_v31, %v1935_v43  ;;  %v1115_v61 = vpop.f32.mrf.mxu0 }
 0x11d   : > { %v1125_v3 = vadd.f32 %v1112_v55, %v1043_v0 }
 0x11f   : > { %v1137_v4 = vadd.f32 %v1944_v59, %v1125_v3 }
 0x120   : > { %v951_v5 = vpop.f32.mrf.mxu2 }
 0x121   : > { %v1145_v9 = vmax.f32 %v1137_v4, 0.0  ;;  %v962_v10 = vadd.f32 %v951_v5, %v880_v30  ;;  %v1033_v6 = vpop.f32.mrf.mxu3 }
 0x122   : > { %v871_v11 = vpop.f32.mrf.mxu1 }
 0x123   : > { %v1562_v40 = vpack.c.bf16 %v1145_v9, %v1144_v8  ;;  %v1044_v44 = vadd.f32 %v1033_v6, %v962_v10  ;;  %v881_v13 = vadd.f32 %v871_v11, %v799_v12  ;;  %v1117_v22 = vpop.f32.mrf.mxu0 }
 0x125   : > { %1570 = vst [vmem:[%s1952_s21 + $0x10] sm:$0xff] %v1562_v40   ;;  %v1126_v15 = vadd.f32 %v1115_v61, %v1044_v44 }
 0x127   : > { %v1138_v23 = vadd.f32 %v1944_v59, %v1126_v15 }
 0x128   : > { %v953_v14 = vpop.f32.mrf.mxu2 }
 0x129   : > { %v963_v43 = vadd.f32 %v953_v14, %v881_v13  ;;  %v1035_v45 = vpop.f32.mrf.mxu3  ;;  %v1146_v58 = vmax.f32 %v1138_v23, 0.0 }
 0x12b   : > { %v1045_v17 = vadd.f32 %v1035_v45, %v963_v43 }
 0x12d   : > { %v1127_v24 = vadd.f32 %v1117_v22, %v1045_v17 }
 0x12f   : > { %v1139_v42 = vadd.f32 %v1944_v59, %v1127_v24 }
 0x131   : > { %v1147_v16 = vmax.f32 %v1139_v42, 0.0 }
 0x133   : > { %v1567_v20 = vpack.c.bf16 %v1147_v16, %v1146_v58 }
 0x135   : > { %1571 = vst [vmem:[%s1952_s21 + $0x18] sm:$0xff] %v1567_v20  }
 0x136   : > { %1645 = shalt.err (!%p1642_p3)
}
 0x137   : > { %s1682_s19 = smov 64   ;;  %s1683_s21 = smov 4  }
 0x138   : > { %1576 = dma.vmem_to_hbm [thread:$0]  (%p1767_p5), %s1178_s10, 512, %s1180_s17, %s1165_s9, %s1682_s19, %s1682_s19, %s1683_s21  }
 0x139 PF: > { %p1582_p4 = scmp.ge.s32.totalorder %s1680_s30, 2  ;;  %s1194_s25 = sand.u32 1, %s1668_s27  }
 0x13a   : > { %s1195_s26 = scalar_lea.sflag [#allocation3], %s1194_s25 }
 0x13b   : > { %p1579_p7 = pnand %p1582_p4, %p1771_p6 }
 0x13d   : > { %p1580_p8 = pneg %p1579_p7 }
 0x13f   : > { %1663 = dma.done.wait (%p1580_p8), %s1195_s26, 512  }
 0x140   : > { %1665 = vsyncadd (%p1580_p8), %s1195_s26, 4294966784  ;;  %p18_p9 = scmp.ge.s32.totalorder %s1754_s11, 4   ;;  %s2024_s27 = smov %s1672_s28 }
 0x141   : > { %s2025_s28 = smov %s1676_s29  ;;  %s2026_s29 = smov %s1765_s14 }
 0x142   : > { %s2027_s30 = smov %s1754_s11  ;;  %20 = sbr.rel (!%p18_p9) target bundleno = 5 (0x5), region = 110 }
 0x147   :  { %1201 = vsyncpa [#allocation3], 1 }
 0x148   :  { %1203 = vsyncpa [#allocation3 + $0x1], 1 }

</bundles_post_ra>
